<compile_context>
chip_gen: v5e
topology: v5e:2x2
jax: 0.10.0
libtpu: 0.0.40
codegen_flags: <defaults>
</compile_context>

<pallas_src>
import functools

import jax
import jax.numpy as jnp
from jax.experimental import pallas as pl
from jax.experimental.pallas import tpu as pltpu


def _d_logits_cond_kernel(img_ref, txt_ref, w1_ref, s1_ref, b1_ref,
                          w2_ref, b2_ref, out_ref, pad_ref,
                          *, N, H, W, C_IMG, C_TXT, C_MID):
    """bcondition=True path: jointConv (conv3x3 + BN + LeakyReLU) + out_logits.

    img_ref : (N, H, W, C_IMG)             image code, NHWC, f32
    txt_ref : (N, C_TXT)                   text embedding, f32
    w1_ref  : (3, 3, C_IMG+C_TXT, C_MID)   jointConv weights, HWIO, bf16
    s1/b1   : (1, C_MID)                   folded BatchNorm scale / bias, f32
    w2_ref  : (H*W, C_MID)                 out_logits 4x4 conv weights, f32
    b2_ref  : (1, 1)                       out_logits bias
    out_ref : (N, 1)                       sigmoid(logits)
    pad_ref : (N, H+2, W+2, C_IMG+C_TXT)   VMEM scratch (padded + concatenated)
    """
    C_IN = C_IMG + C_TXT

    # Build the zero-padded, channel-concatenated input once in VMEM (no grid,
    # so this zero-fill happens exactly once; channel slices are lane-aligned).
    pad_ref[...] = jnp.zeros_like(pad_ref)
    pad_ref[:, 1:H + 1, 1:W + 1, :C_IMG] = img_ref[...]
    txt = txt_ref[...]                                       # (N, C_TXT)
    pad_ref[:, 1:H + 1, 1:W + 1, C_IMG:] = jnp.broadcast_to(
        txt[:, None, None, :], (N, H, W, C_TXT))

    # conv3x3 (stride 1, pad 1, bias=False): 9 shifted bf16 matmuls on the MXU.
    # Rows = N*H*W (batch folded in), K = C_IN = 768, lanes = C_MID = 512.
    acc = jnp.zeros((N * H * W, C_MID), jnp.float32)
    for dy in range(3):
        for dx in range(3):
            patch = pad_ref[:, dy:dy + H, dx:dx + W, :].reshape(N * H * W, C_IN)
            acc = acc + jnp.dot(patch.astype(jnp.bfloat16), w1_ref[dy, dx],
                                preferred_element_type=jnp.float32)

    # Folded BatchNorm (eval mode) + LeakyReLU(0.2), f32 elementwise.
    y = acc * s1_ref[...] + b1_ref[...]                      # (N*H*W, C_MID)
    y = jnp.where(y >= 0, y, 0.2 * y)

    # out_logits: Conv2d(C_MID, 1, kernel=4, stride=4) over the full 4x4 map
    # == per-batch dot with w2, + bias, then sigmoid.
    h = y.reshape(N, H * W, C_MID)
    part = jnp.sum(h * w2_ref[...][None], axis=2)            # (N, H*W)
    logits = jnp.sum(part, axis=1, keepdims=True) + b2_ref[...]
    out_ref[...] = jax.nn.sigmoid(logits).astype(out_ref.dtype)


def _d_logits_plain_kernel(img_ref, w2_ref, b2_ref, out_ref, *, N, H, W, C):
    """bcondition=False path: out_logits only (4x4/stride-4 conv + sigmoid)."""
    x = img_ref[...].reshape(N, H * W, C)                    # f32, lane-dense C
    part = jnp.sum(x * w2_ref[...][None], axis=2)            # (N, H*W)
    logits = jnp.sum(part, axis=1, keepdims=True) + b2_ref[...]
    out_ref[...] = jax.nn.sigmoid(logits).astype(out_ref.dtype)


def d_logits_pallas(image_code, out_w, out_b, *, joint_w=None, joint_bn=None,
                    text_embed=None, bcondition=False, eps=1e-5):
    """D_LOGITS forward.

    image_code : (N, 512, 4, 4)  NCHW (PyTorch layout)
    out_w      : (1, 512, 4, 4)  out_logits Conv2d weight (OIHW), bias out_b (1,)
    joint_w    : (512, 768, 3, 3) jointConv weight (OIHW), bias=False
    joint_bn   : (gamma, beta, running_mean, running_var), each (512,)
    text_embed : (N, 256)
    Returns (N,) = sigmoid(logits), matching mix_code.view(-1).
    """
    x = jnp.transpose(image_code, (0, 2, 3, 1)).astype(jnp.float32)   # NHWC
    N, H, W, C_img = x.shape

    # out_logits 4x4 conv weight -> (H*W, C) rows in (kh, kw) order; f32.
    c_head = out_w.shape[1]
    w2 = jnp.transpose(out_w[0], (1, 2, 0)).reshape(H * W, c_head).astype(jnp.float32)
    b2 = out_b.reshape(1, 1).astype(jnp.float32)

    cparams = pltpu.CompilerParams(vmem_limit_bytes=32 * 1024 * 1024)
    vmem = pl.BlockSpec(memory_space=pltpu.MemorySpace.VMEM)

    if bcondition and text_embed is not None:
        txt = text_embed.reshape(N, -1).astype(jnp.float32)           # (N, 256)
        C_txt = txt.shape[1]
        C_mid = joint_w.shape[0]

        # OIHW -> HWIO, bf16 operands for the MXU (accumulation stays f32).
        w1 = jnp.transpose(joint_w, (2, 3, 1, 0)).astype(jnp.bfloat16)

        # TODO(synk): BatchNorm2d is folded with eval-mode running stats;
        # training-mode batch statistics are not implemented.
        gamma, beta, mean, var = (p.astype(jnp.float32) for p in joint_bn)
        s1 = gamma / jnp.sqrt(var + eps)
        b1 = beta - mean * s1
        s1 = s1.reshape(1, C_mid)
        b1 = b1.reshape(1, C_mid)

        kernel = functools.partial(_d_logits_cond_kernel, N=N, H=H, W=W,
                                   C_IMG=C_img, C_TXT=C_txt, C_MID=C_mid)
        out = pl.pallas_call(
            kernel,
            out_shape=jax.ShapeDtypeStruct((N, 1), jnp.float32),
            in_specs=[vmem, vmem, vmem, vmem, vmem, vmem, vmem],
            out_specs=vmem,
            scratch_shapes=[pltpu.VMEM((N, H + 2, W + 2, C_img + C_txt),
                                       jnp.float32)],
            compiler_params=cparams,
        )(x, txt, w1, s1, b1, w2, b2)
    else:
        kernel = functools.partial(_d_logits_plain_kernel, N=N, H=H, W=W,
                                   C=C_img)
        out = pl.pallas_call(
            kernel,
            out_shape=jax.ShapeDtypeStruct((N, 1), jnp.float32),
            in_specs=[vmem, vmem, vmem],
            out_specs=vmem,
            compiler_params=cparams,
        )(x, w2, b2)

    return out.reshape(-1)


def d_logits_ref(image_code, out_w, out_b, *, joint_w=None, joint_bn=None,
                 text_embed=None, bcondition=False, eps=1e-5):
    """Pure-JAX reference (lax.conv, NCHW/OIHW like PyTorch)."""
    x = image_code.astype(jnp.float32)
    if bcondition and text_embed is not None:
        N = x.shape[0]
        t = text_embed.reshape(N, -1, 1, 1).astype(jnp.float32)
        t = jnp.broadcast_to(t, (N, t.shape[1], x.shape[2], x.shape[3]))
        mix = jnp.concatenate([x, t], axis=1)
        dn = jax.lax.conv_dimension_numbers(mix.shape, joint_w.shape,
                                            ('NCHW', 'OIHW', 'NCHW'))
        h = jax.lax.conv_general_dilated(
            mix.astype(jnp.bfloat16), joint_w.astype(jnp.bfloat16),
            (1, 1), 'SAME', dimension_numbers=dn,
            preferred_element_type=jnp.float32)
        gamma, beta, mean, var = (p.astype(jnp.float32).reshape(1, -1, 1, 1)
                                  for p in joint_bn)
        h = (h - mean) / jnp.sqrt(var + eps) * gamma + beta
        x = jnp.where(h >= 0, h, 0.2 * h)
    dn = jax.lax.conv_dimension_numbers(x.shape, out_w.shape,
                                        ('NCHW', 'OIHW', 'NCHW'))
    logit = jax.lax.conv_general_dilated(x, out_w.astype(jnp.float32),
                                         (4, 4), 'VALID', dimension_numbers=dn)
    logit = logit + out_b.reshape(1, 1, 1, 1)
    return jax.nn.sigmoid(logit).reshape(-1)


if __name__ == "__main__":
    # Shapes implied by the module: image_code (N, 512, 4, 4), text_embed (N, 256).
    N, C_IMG, C_TXT, H, W = 2, 512, 256, 4, 4
    key = jax.random.PRNGKey(0)
    ks = jax.random.split(key, 9)

    image_code = jax.random.normal(ks[0], (N, C_IMG, H, W), jnp.float32)
    text_embed = jax.random.normal(ks[1], (N, C_TXT), jnp.float32)

    # out_logits = Conv2d(512, 1, kernel_size=4, stride=4) (bias=True) + Sigmoid.
    out_w = 0.005 * jax.random.normal(ks[2], (1, C_IMG, 4, 4), jnp.float32)
    out_b = 0.1 * jax.random.normal(ks[3], (1,), jnp.float32)

    # jointConv = conv3x3(768 -> 512, bias=False) + BatchNorm2d(512) + LeakyReLU(0.2).
    joint_w = 0.05 * jax.random.normal(ks[4], (C_IMG, C_IMG + C_TXT, 3, 3), jnp.float32)
    joint_bn = (1.0 + 0.1 * jax.random.normal(ks[5], (C_IMG,), jnp.float32),   # gamma
                0.1 * jax.random.normal(ks[6], (C_IMG,), jnp.float32),         # beta
                0.1 * jax.random.normal(ks[7], (C_IMG,), jnp.float32),         # running_mean
                1.0 + jax.nn.softplus(jax.random.normal(ks[8], (C_IMG,))))     # running_var

    # --- bcondition=False (module default): out_logits only ---
    out_plain = jax.block_until_ready(d_logits_pallas(image_code, out_w, out_b))
    ref_plain = jax.block_until_ready(d_logits_ref(image_code, out_w, out_b))
    assert out_plain.shape == (N,)
    err0 = jnp.max(jnp.abs(out_plain - ref_plain))
    assert jnp.allclose(out_plain, ref_plain, atol=1e-4, rtol=1e-4), \
        f"plain path max abs err = {err0}"

    # --- bcondition=True: jointConv (conv3x3 + BN + LeakyReLU) then out_logits ---
    out_cond = jax.block_until_ready(d_logits_pallas(
        image_code, out_w, out_b, joint_w=joint_w, joint_bn=joint_bn,
        text_embed=text_embed, bcondition=True))
    ref_cond = jax.block_until_ready(d_logits_ref(
        image_code, out_w, out_b, joint_w=joint_w, joint_bn=joint_bn,
        text_embed=text_embed, bcondition=True))
    assert out_cond.shape == (N,)
    err1 = jnp.max(jnp.abs(out_cond - ref_cond))
    assert jnp.allclose(out_cond, ref_cond, atol=2e-3, rtol=2e-3), \
        f"cond path max abs err = {err1}"

    print("KERNEL_OK")
</pallas_src>

<mosaic_0001>
module attributes {stable_mosaic.version = 11 : i64} {
  func.func @_d_logits_plain_kernel(%arg0: memref<2x4x4x512xf32, #tpu.memory_space<vmem>>, %arg1: memref<16x512xf32, #tpu.memory_space<vmem>>, %arg2: memref<1x1xf32, #tpu.memory_space<vmem>>, %arg3: memref<2x1xf32, #tpu.memory_space<vmem>>) attributes {dimension_semantics = [], scalar_prefetch = 0 : i64, scratch_operands = 0 : i64, tpu.core_type = #tpu.core_type<tc>} {
    %c0 = arith.constant 0 : index
    %c0_0 = arith.constant 0 : index
    %c0_1 = arith.constant 0 : index
    %c0_2 = arith.constant 0 : index
    %0 = vector.load %arg0[%c0, %c0_0, %c0_1, %c0_2] : memref<2x4x4x512xf32, #tpu.memory_space<vmem>>, vector<2x4x4x512xf32>
    %1 = vector.shape_cast %0 : vector<2x4x4x512xf32> to vector<2x16x512xf32>
    %c0_3 = arith.constant 0 : index
    %c0_4 = arith.constant 0 : index
    %2 = vector.load %arg1[%c0_3, %c0_4] : memref<16x512xf32, #tpu.memory_space<vmem>>, vector<16x512xf32>
    %3 = vector.shape_cast %2 : vector<16x512xf32> to vector<1x16x512xf32>
    %4 = vector.broadcast %3 : vector<1x16x512xf32> to vector<2x16x512xf32>
    %5 = arith.mulf %1, %4 : vector<2x16x512xf32>
    %cst = arith.constant dense<0.000000e+00> : vector<2x16xf32>
    %6 = vector.multi_reduction <add>, %5, %cst [2] : vector<2x16x512xf32> to vector<2x16xf32>
    %cst_5 = arith.constant dense<0.000000e+00> : vector<2xf32>
    %7 = vector.multi_reduction <add>, %6, %cst_5 [1] : vector<2x16xf32> to vector<2xf32>
    %8 = vector.shape_cast %7 : vector<2xf32> to vector<2x1xf32>
    %c0_6 = arith.constant 0 : index
    %c0_7 = arith.constant 0 : index
    %9 = vector.load %arg2[%c0_6, %c0_7] : memref<1x1xf32, #tpu.memory_space<vmem>>, vector<1x1xf32>
    %10 = vector.broadcast %9 : vector<1x1xf32> to vector<2x1xf32>
    %11 = arith.addf %8, %10 : vector<2x1xf32>
    %12 = arith.negf %11 : vector<2x1xf32>
    %13 = math.exp %12 : vector<2x1xf32>
    %cst_8 = arith.constant 1.000000e+00 : f32
    %14 = vector.broadcast %cst_8 : f32 to vector<2x1xf32>
    %15 = arith.addf %14, %13 : vector<2x1xf32>
    %16 = arith.divf %14, %15 : vector<2x1xf32>
    %c0_9 = arith.constant 0 : index
    %c0_10 = arith.constant 0 : index
    %17 = vector.load %arg3[%c0_9, %c0_10] : memref<2x1xf32, #tpu.memory_space<vmem>>, vector<2x1xf32>
    tpu.vector_store %arg3[%c0_9, %c0_10], %16 {strides = array<i32>} : memref<2x1xf32, #tpu.memory_space<vmem>>, vector<2x1xf32>,
    return
  }
}

</mosaic_0001>

<bundles_post_ra>
// kernel: tpu_custom_call.1
= control target key start
LH: loop header
LB: loop body
LE: loop exit
PB: predicated region body
PF: predicated region fallthrough
CT: control target
= control target key end

     0   :  { %s375_s0 = inlined_call_operand.hbm [shape: f32[2,4,4,512], index: 0, kind: input, shape index: {}]   ;;  %s376_s1 = inlined_call_operand.hbm [shape: f32[16,512], index: 1, kind: input, shape index: {}]   ;;  %s377_s2 = inlined_call_operand.<no memory space> [shape: f32[1,1], index: 2, kind: input, shape index: {}]   ;;  %s378_s3 = inlined_call_operand.vmem [shape: f32[2,1], index: 3, kind: output, shape index: {}]  }
   0x1   :  { %v8_v0 = vstv %s377_s2 }
   0x2   :  { %9 = vst [vmem:[#allocation2] sm:$0x1] %v8_v0 }
   0x3   :  { %10 = vsyncpa [#allocation4], 0  ;;  %s16_s16 = sshll.u32 %s375_s0, 4  ;;  %s17_s16 = int_to_ptr.hbm [resolvable:$true] %s16_s16 }
   0x4   :  { %11 = vsyncpa [#allocation6], 0  ;;  %s329_s17 = smov [#allocation3]   ;;  %s29_s21 = sshll.u32 %s376_s1, 4  ;;  %s30_s21 = int_to_ptr.hbm [resolvable:$true] %s29_s21 }
   0x5   :  { %s18_s18 = sshll.u32 %s329_s17, 4  ;;  %s330_s22 = smov 256   ;;  %s19_s18 = int_to_ptr.vmem [resolvable:$true] %s18_s18 }
   0x6   :  { %s331_s23 = smov 16   ;;  %s332_s2 = smov [#allocation5]  }
   0x7   :  { %24 = dma.hbm_to_vmem [thread:$0]  %s17_s16, 2048, %s19_s18, [#allocation4], %s330_s22, %s330_s22, %s331_s23  }
   0x8   :  { %s31_s24 = sshll.u32 %s332_s2, 4  ;;  %s333_s25 = smov 512   ;;  %s32_s24 = int_to_ptr.vmem [resolvable:$true] %s31_s24 }
   0x9   :  { %s334_s26 = smov 32  }
   0xa   :  { %37 = dma.hbm_to_vmem [thread:$0]  %s30_s21, 1024, %s32_s24, [#allocation6], %s333_s25, %s333_s25, %s334_s26  }
   0xb   :  { %325 = dma.done.wait [#allocation4], 2048  }
   0xc   :  { %326 = vsyncadd [#allocation4], 4294965248 }
   0xd   :  { %327 = dma.done.wait [#allocation6], 1024  }
   0xe   :  { %328 = vsyncadd [#allocation6], 4294966272  ;;  %v64_v1 = vld [vmem:[#allocation5] sm:$0xff]  ;;  %v65_v2 = vld [vmem:[#allocation5 + $0x8] sm:$0xff]  ;;  %vm84_vm0 = vcmask 1043456   ;;  %vm221_vm1 = vcmask 130112  }
   0xf   :  { %v66_v3 = vld [vmem:[#allocation5 + $0x10] sm:$0xff]  ;;  %v67_v4 = vld [vmem:[#allocation5 + $0x18] sm:$0xff]  ;;  %v48_v5 = vld [vmem:[#allocation3] sm:$0xff]  ;;  %v80_v7 = vrot.slane %v65_v2, 4  ;;  %vm226_vm2 = vcmask 1041409   ;;  %vm229_vm3 = vcmask 123904  }
  0x10   :  { %v49_v6 = vld [vmem:[#allocation3 + $0x8] sm:$0xff]  ;;  %v81_v8 = vrot.slane %v67_v4, 4  ;;  %v50_v9 = vld [vmem:[#allocation3 + $0x10] sm:$0xff]  ;;  %v51_v10 = vld [vmem:[#allocation3 + $0x18] sm:$0xff]  ;;  %vm257_vm6 = vcmask 1024  }
  0x11   :  { %v85_v11 = vsel %vm84_vm0, %v64_v1, %v80_v7  ;;  %v87_v13 = vsel %vm84_vm0, %v80_v7, %v64_v1  ;;  %v68_v15 = vld [vmem:[#allocation5 + $0x20] sm:$0xff]  ;;  %v69_v20 = vld [vmem:[#allocation5 + $0x28] sm:$0xff]  ;;  %v70_v21 = vld [vmem:[#allocation5 + $0x30] sm:$0xff] }
  0x12   :  { %v86_v12 = vsel %vm84_vm0, %v66_v3, %v81_v8  ;;  %v89_v14 = vsel %vm84_vm0, %v81_v8, %v66_v3  ;;  %v88_v16 = vrot.slane %v87_v13, 4  ;;  %v105_v18 = vmul.f32 %v85_v11, %v48_v5  ;;  %v71_v22 = vld [vmem:[#allocation5 + $0x38] sm:$0xff]  ;;  %v52_v23 = vld [vmem:[#allocation3 + $0x20] sm:$0xff]  ;;  %v53_v24 = vld [vmem:[#allocation3 + $0x28] sm:$0xff] }
  0x13   :  { %v90_v17 = vrot.slane %v89_v14, 4  ;;  %v106_v19 = vmul.f32 %v86_v12, %v49_v6  ;;  %v82_v25 = vrot.slane %v69_v20, 4  ;;  %v83_v26 = vrot.slane %v71_v22, 4  ;;  %v54_v29 = vld [vmem:[#allocation3 + $0x30] sm:$0xff]  ;;  %v55_v30 = vld [vmem:[#allocation3 + $0x38] sm:$0xff]  ;;  %v57_v39 = vld [vmem:[#allocation3 + $0x48] sm:$0xff] }
  0x14   :  { %v107_v27 = vmul.f32 %v88_v16, %v50_v9  ;;  %137 = vst [vmem:[#allocation1] ss:$2 sm:$0xff] %v105_v18  ;;  %v59_v42 = vld [vmem:[#allocation3 + $0x58] sm:$0xff]  ;;  %v56_v43 = vld [vmem:[#allocation3 + $0x40] sm:$0xff]  ;;  %v58_v44 = vld [vmem:[#allocation3 + $0x50] sm:$0xff]  ;;  %v114_v45 = vmul.f32 %v86_v12, %v57_v39  ;;  %v216_v22 = vlaneseq }
  0x15   :  { %v108_v28 = vmul.f32 %v90_v17, %v51_v10  ;;  %141 = vst [vmem:[#allocation1 + $0x10] ss:$2 sm:$0xff] %v106_v19  ;;  %v91_v31 = vsel %vm84_vm0, %v68_v15, %v82_v25  ;;  %v92_v32 = vsel %vm84_vm0, %v70_v21, %v83_v26  ;;  %v93_v33 = vsel %vm84_vm0, %v82_v25, %v68_v15  ;;  %v60_v47 = vld [vmem:[#allocation3 + $0x60] sm:$0xff]  ;;  %v62_v48 = vld [vmem:[#allocation3 + $0x70] sm:$0xff]  ;;  %v61_v56 = vld [vmem:[#allocation3 + $0x68] sm:$0xff] }
  0x16   :  { %v95_v34 = vsel %vm84_vm0, %v83_v26, %v70_v21  ;;  %139 = vst [vmem:[#allocation1 + $0x1] ss:$2 sm:$0xff] %v107_v27  ;;  %v94_v35 = vrot.slane %v93_v33, 4  ;;  %v109_v37 = vmul.f32 %v91_v31, %v52_v23  ;;  %v110_v38 = vmul.f32 %v92_v32, %v53_v24  ;;  %v63_v58 = vld [vmem:[#allocation3 + $0x78] sm:$0xff] }
  0x17   :  { %v96_v36 = vrot.slane %v95_v34, 4  ;;  %143 = vst [vmem:[#allocation1 + $0x11] ss:$2 sm:$0xff] %v108_v28  ;;  %v116_v46 = vmul.f32 %v90_v17, %v59_v42  ;;  %v113_v49 = vmul.f32 %v85_v11, %v56_v43  ;;  %v115_v52 = vmul.f32 %v88_v16, %v58_v44 }
  0x18   :  { %v111_v40 = vmul.f32 %v94_v35, %v54_v29  ;;  %145 = vst [vmem:[#allocation1 + $0x20] ss:$2 sm:$0xff] %v109_v37  ;;  %v117_v59 = vmul.f32 %v91_v31, %v60_v47  ;;  %v119_v60 = vmul.f32 %v94_v35, %v62_v48  ;;  %v118_v63 = vmul.f32 %v92_v32, %v61_v56 }
  0x19   :  { %v112_v41 = vmul.f32 %v96_v36, %v55_v30  ;;  %149 = vst [vmem:[#allocation1 + $0x30] ss:$2 sm:$0xff] %v110_v38  ;;  %v120_v1 = vmul.f32 %v96_v36, %v63_v58  ;;  %v217_v23 = vand.u32 127, %v216_v22  ;;  %v272_v36 = vld [vmem:[#allocation2] ss:$0 sm:$0xff] }
  0x1a   :  { %147 = vst [vmem:[#allocation1 + $0x21] ss:$2 sm:$0xff] %v111_v40 }
  0x1b   :  { %151 = vst [vmem:[#allocation1 + $0x31] ss:$2 sm:$0xff] %v112_v41  ;;  %v219_v25 = vadd.s32 4294967288, %v217_v23 }
  0x1d   :  { %v152_v50 = vld.sshfl [vmem:[#allocation1] sm:$0xff pattern:$0x75316420]  ;;  %v153_v51 = vld.sshfl [vmem:[#allocation1 + $0x8] sm:$0xff pattern:$0x75316420] }
  0x1e   :  { %v154_v53 = vld.sshfl [vmem:[#allocation1 + $0x10] sm:$0xff pattern:$0x75316420]  ;;  %v155_v54 = vld.sshfl [vmem:[#allocation1 + $0x18] sm:$0xff pattern:$0x75316420]  ;;  %v192_v55 = vadd.f32 %v153_v51, %v152_v50 }
  0x1f   :  { %162 = vst [vmem:[#allocation1 + $0x10] ss:$2 sm:$0xff] %v114_v45 }
  0x20   :  { %163 = vst [vmem:[#allocation1 + $0x11] ss:$2 sm:$0xff] %v116_v46  ;;  %v193_v57 = vadd.f32 %v192_v55, %v154_v53 }
  0x21   :  { %160 = vst [vmem:[#allocation1] ss:$2 sm:$0xff] %v113_v49  ;;  %v156_v61 = vld.sshfl [vmem:[#allocation1 + $0x20] sm:$0xff pattern:$0x75316420] }
  0x22   :  { %v194_v62 = vadd.f32 %v193_v57, %v155_v54  ;;  %161 = vst [vmem:[#allocation1 + $0x1] ss:$2 sm:$0xff] %v115_v52  ;;  %v157_v0 = vld.sshfl [vmem:[#allocation1 + $0x28] sm:$0xff pattern:$0x75316420] }
  0x23   :  { %v158_v2 = vld.sshfl [vmem:[#allocation1 + $0x30] sm:$0xff pattern:$0x75316420]  ;;  %v159_v3 = vld.sshfl [vmem:[#allocation1 + $0x38] sm:$0xff pattern:$0x75316420]  ;;  %v197_v4 = vadd.f32 %v157_v0, %v156_v61 }
  0x24   :  { %195 = vadd.xlane.f32.xlu0 %v194_v62  ;;  %164 = vst [vmem:[#allocation1 + $0x20] ss:$2 sm:$0xff] %v117_v59 }
  0x25   :  { %165 = vst [vmem:[#allocation1 + $0x21] ss:$2 sm:$0xff] %v119_v60  ;;  %v198_v5 = vadd.f32 %v197_v4, %v158_v2 }
  0x26   :  { %166 = vst [vmem:[#allocation1 + $0x30] ss:$2 sm:$0xff] %v118_v63 }
  0x27   :  { %167 = vst [vmem:[#allocation1 + $0x31] ss:$2 sm:$0xff] %v120_v1  ;;  %v199_v6 = vadd.f32 %v198_v5, %v159_v3  ;;  %v170_v7 = vld.sshfl [vmem:[#allocation1 + $0x10] sm:$0xff pattern:$0x75316420] }
  0x28   :  { %v171_v11 = vld.sshfl [vmem:[#allocation1 + $0x18] sm:$0xff pattern:$0x75316420] }
  0x29   :  { %v168_v8 = vld.sshfl [vmem:[#allocation1] sm:$0xff pattern:$0x75316420]  ;;  %v169_v9 = vld.sshfl [vmem:[#allocation1 + $0x8] sm:$0xff pattern:$0x75316420] }
  0x2a   :  { %v202_v10 = vadd.f32 %v169_v9, %v168_v8 }
  0x2c   :  { %200 = vadd.xlane.f32.xlu0 %v199_v6  ;;  %v203_v12 = vadd.f32 %v202_v10, %v170_v7  ;;  %v172_v13 = vld.sshfl [vmem:[#allocation1 + $0x20] sm:$0xff pattern:$0x75316420]  ;;  %v173_v14 = vld.sshfl [vmem:[#allocation1 + $0x28] sm:$0xff pattern:$0x75316420] }
  0x2d   :  { %v207_v15 = vadd.f32 %v173_v14, %v172_v13 }
  0x2e   :  { %v204_v16 = vadd.f32 %v203_v12, %v171_v11  ;;  %v174_v17 = vld.sshfl [vmem:[#allocation1 + $0x30] sm:$0xff pattern:$0x75316420]  ;;  %v175_v19 = vld.sshfl [vmem:[#allocation1 + $0x38] sm:$0xff pattern:$0x75316420] }
  0x2f   :  { %v208_v18 = vadd.f32 %v207_v15, %v174_v17 }
  0x30   :  { %205 = vadd.xlane.f32.xlu1 %v204_v16 }
  0x31   :  { %v209_v20 = vadd.f32 %v208_v18, %v175_v19 }
  0x38   :  { %210 = vadd.xlane.f32.xlu1 %v209_v20 }
  0x97   :  { %v196_v21 = vpop.xlane.xlu0 %195 }
  0x98   :  { %v218_v27 = vperm.slane %v196_v21, %v217_v23 }
  0x9f   :  { %v201_v26 = vpop.xlane.xlu0 %200 }
  0xa0   :  { %v220_v28 = vperm.slane %v201_v26, %v219_v25 }
  0xa2   :  { %v222_v32 = vsel %vm221_vm1, %v220_v28, %v218_v27 }
  0xa3   :  { %v206_v24 = vpop.xlane.xlu1 %205 }
  0xa4   :  { %v223_v30 = vperm.slane %v206_v24, %v217_v23 }
  0xab   :  { %v211_v29 = vpop.xlane.xlu1 %210 }
  0xac   :  { %v224_v31 = vperm.slane %v211_v29, %v219_v25 }
  0xae   :  { %v225_v33 = vsel %vm221_vm1, %v224_v31, %v223_v30 }
  0xaf   :  { %v227_v34 = vsel %vm226_vm2, %v225_v33, %v222_v32 }
  0xb0   :  { %v230_v35 = vsel %vm229_vm3, %v227_v34, 0.0 }
  0xb1   :  { %231 = vadd.xlane.f32.xlu2 %v230_v35 }
 0x124   :  { %v232_v37 = vpop.xlane.xlu2 %231 }
 0x125   :  { %v237_v38 = vadd.f32 %v272_v36, %v232_v37 }
 0x127   :  { %v265_v39 = vmul.f32 -1.442695, %v237_v38 }
 0x129   :  { %273 = vpow2.f32 %v265_v39 }
 0x12f   :  { %v274_v40 = vpop.eup %273 }
 0x130   :  { %v241_v41 = vadd.f32 1.0, %v274_v40 }
 0x132   :  { %275 = vrcp.f32 %v241_v41  ;;  %v253_v45 = vand.u32 2147483648, %v241_v41  ;;  %v251_v47 = vand.u32 2147483647, %v241_v41  ;;  %vm247_vm5 = vweird.f32 %v241_v41 }
 0x134   :  { %v254_v49 = vor.u32 1.1754944e-38, %v253_v45  ;;  %vm252_vm8 = vcmp.eq.f32.partialorder %v251_v47, 8.507059e+37 }
 0x138   :  { %v276_v42 = vpop.eup %275 }
 0x139   :  { %v243_v43 = vmul.f32 %v276_v42, %v241_v41  ;;  %vm248_vm4 = vweird.f32 %v276_v42 }
 0x13a   :  { %vm249_vm7 = vmor %vm247_vm5, %vm248_vm4 }
 0x13b   :  { %v244_v44 = vsub.f32 1.0, %v243_v43 }
 0x13d   :  { %v245_v46 = vmul.f32 %v276_v42, %v244_v44 }
 0x13f   :  { %v246_v48 = vadd.f32 %v276_v42, %v245_v46 }
 0x141   :  { %v250_v50 = vsel %vm249_vm7, %v276_v42, %v246_v48 }
 0x142   :  { %v255_v51 = vsel %vm252_vm8, %v254_v49, %v250_v50 }
 0x143   :  { %258 = vst.msk [vmem:[%s378_s3] sm:$0x3] %vm257_vm6, %v255_v51 }
 0x144   :  { %263 = vsyncpa [#allocation4], 1 }
 0x145   :  { %264 = vsyncpa [#allocation6], 1 }

</bundles_post_ra>
